<compile_context>
chip_gen: v6e
topology: v6e:2x2x1
jax: 0.10.0
libtpu: 0.0.40
codegen_flags: <defaults>
</compile_context>

<pallas_src>
import math
from functools import partial

import jax
import jax.numpy as jnp
from jax import lax
from jax.experimental import pallas as pl
from jax.experimental.pallas import tpu as pltpu

MAX_CLAMP_VALUE = 50000.0
MASK_FILL = -9e15  # torch masked_fill value in the reference module
_VMEM_LIMIT = 48 * 1024 * 1024  # < 64 MiB (v7x per-TC), well under v5e/v6e


def _pick_tile(dim, target, align):
    """Largest tile <= target that divides dim and respects alignment; else full dim."""
    if dim <= target:
        return dim
    for t in range(target, align - 1, -1):
        if dim % t == 0 and t % align == 0:
            return t
    return dim


# ---------------------------------------------------------------------------
# Kernel 1: LayerNorm over the last dim (rows tiled)
# ---------------------------------------------------------------------------
def _layer_norm_kernel(x_ref, g_ref, b_ref, o_ref, *, eps):
    x = x_ref[...].astype(jnp.float32)
    mu = jnp.mean(x, axis=-1, keepdims=True)
    xc = x - mu
    var = jnp.mean(xc * xc, axis=-1, keepdims=True)
    inv = lax.rsqrt(var + eps)
    y = xc * inv * g_ref[...].astype(jnp.float32) + b_ref[...].astype(jnp.float32)
    o_ref[...] = y.astype(o_ref.dtype)


def layer_norm(x, gamma, beta, *, eps=1e-5, tm_target=256):
    M, D = x.shape
    tm = _pick_tile(M, tm_target, 8)
    return pl.pallas_call(
        partial(_layer_norm_kernel, eps=eps),
        out_shape=jax.ShapeDtypeStruct((M, D), x.dtype),
        grid_spec=pltpu.PrefetchScalarGridSpec(
            num_scalar_prefetch=0,
            grid=(M // tm,),
            in_specs=[
                pl.BlockSpec((tm, D), lambda i: (i, 0)),
                pl.BlockSpec((1, D), lambda i: (0, 0)),
                pl.BlockSpec((1, D), lambda i: (0, 0)),
            ],
            out_specs=pl.BlockSpec((tm, D), lambda i: (i, 0)),
        ),
        compiler_params=pltpu.CompilerParams(
            dimension_semantics=("parallel",),
            vmem_limit_bytes=_VMEM_LIMIT),
    )(x, gamma.reshape(1, D), beta.reshape(1, D))


# ---------------------------------------------------------------------------
# Kernel 2: tiled  y = x @ W + b   (optionally fused:  y = res + gamma * (x@W + b))
# ---------------------------------------------------------------------------
def _matmul_bias_kernel(x_ref, w_ref, b_ref, o_ref, acc_ref):
    @pl.when(pl.program_id(2) == 0)
    def _():
        acc_ref[...] = jnp.zeros_like(acc_ref)

    acc_ref[...] += jnp.dot(x_ref[...], w_ref[...],
                            preferred_element_type=jnp.float32)

    @pl.when(pl.program_id(2) == pl.num_programs(2) - 1)
    def _():
        o_ref[...] = (acc_ref[...] + b_ref[...].astype(jnp.float32)).astype(o_ref.dtype)


def _matmul_bias_residual_kernel(x_ref, w_ref, b_ref, g_ref, r_ref, o_ref, acc_ref):
    @pl.when(pl.program_id(2) == 0)
    def _():
        acc_ref[...] = jnp.zeros_like(acc_ref)

    acc_ref[...] += jnp.dot(x_ref[...], w_ref[...],
                            preferred_element_type=jnp.float32)

    @pl.when(pl.program_id(2) == pl.num_programs(2) - 1)
    def _():
        y = acc_ref[...] + b_ref[...].astype(jnp.float32)
        out = r_ref[...].astype(jnp.float32) + g_ref[...].astype(jnp.float32) * y
        o_ref[...] = out.astype(o_ref.dtype)


def linear(x, w, b, *, gamma=None, residual=None,
           tm_target=256, tn_target=512, tk_target=512):
    """x:[M,K] @ w:[K,N] + b:[N]; optionally fused residual + gamma*(...)."""
    M, K = x.shape
    _, N = w.shape
    tm = _pick_tile(M, tm_target, 8)
    tn = _pick_tile(N, tn_target, 128)
    tk = _pick_tile(K, tk_target, 128)
    grid = (M // tm, N // tn, K // tk)

    in_specs = [
        pl.BlockSpec((tm, tk), lambda i, j, k: (i, k)),
        pl.BlockSpec((tk, tn), lambda i, j, k: (k, j)),
        pl.BlockSpec((1, tn), lambda i, j, k: (0, j)),
    ]
    args = [x, w, b.reshape(1, N)]
    if residual is not None:
        assert gamma is not None
        kernel = _matmul_bias_residual_kernel
        in_specs += [
            pl.BlockSpec((1, tn), lambda i, j, k: (0, j)),
            pl.BlockSpec((tm, tn), lambda i, j, k: (i, j)),
        ]
        args += [gamma.reshape(1, N), residual]
    else:
        kernel = _matmul_bias_kernel

    return pl.pallas_call(
        kernel,
        out_shape=jax.ShapeDtypeStruct((M, N), x.dtype),
        grid_spec=pltpu.PrefetchScalarGridSpec(
            num_scalar_prefetch=0,
            grid=grid,
            in_specs=in_specs,
            out_specs=pl.BlockSpec((tm, tn), lambda i, j, k: (i, j)),
            scratch_shapes=[pltpu.VMEM((tm, tn), jnp.float32)],
        ),
        compiler_params=pltpu.CompilerParams(
            dimension_semantics=("parallel", "parallel", "arbitrary"),
            vmem_limit_bytes=_VMEM_LIMIT),
    )(*args)


# ---------------------------------------------------------------------------
# Kernel 3: bidirectional cross-attention, tgt(vision)-tiled with online softmax
#           for the lang side.
# ---------------------------------------------------------------------------
def _bi_attention_kernel(vproj_ref, lproj_ref, mask_ref, ov_ref, ol_ref,
                         m_scr, l_scr, acc_scr,
                         *, num_heads, head_dim, scale):
    t = pl.program_id(1)

    @pl.when(t == 0)
    def _init():
        m_scr[...] = jnp.full_like(m_scr, -jnp.inf)
        l_scr[...] = jnp.zeros_like(l_scr)
        acc_scr[...] = jnp.zeros_like(acc_scr)

    E = num_heads * head_dim
    d = head_dim

    xv = vproj_ref[0].astype(jnp.float32)          # (Tt, 2E): [q | value_v]
    xl = lproj_ref[0].astype(jnp.float32)          # (Nl, 2E): [k | value_l]
    mask = mask_ref[0].astype(jnp.float32)         # (1, Nl) additive

    q_all = xv[:, :E] * scale                      # fold 1/sqrt(d) into q
    vv_all = xv[:, E:]
    k_all = xl[:, :E]
    vl_all = xl[:, E:]

    ctx_v_heads = []
    for h in range(num_heads):
        sl = slice(h * d, (h + 1) * d)
        q_h, k_h = q_all[:, sl], k_all[:, sl]
        vv_h, vl_h = vv_all[:, sl], vl_all[:, sl]

        # scores[t, s] = q_h[t] . k_h[s]  (contract last axes of both; no .T)
        s_h = lax.dot_general(q_h, k_h,
                              dimension_numbers=(((1,), (1,)), ((), ())),
                              preferred_element_type=jnp.float32)   # (Tt, Nl)
        s_h = jnp.clip(s_h, -MAX_CLAMP_VALUE, MAX_CLAMP_VALUE)

        # ---- vision queries -> softmax over lang (mask applied here only) ----
        sv = s_h + mask
        mv = jnp.max(sv, axis=-1, keepdims=True)
        ev = jnp.exp(sv - mv)
        pv = ev * pl.reciprocal(jnp.sum(ev, axis=-1, keepdims=True), approx=True)
        ctx_v_heads.append(
            jnp.dot(pv, vl_h, preferred_element_type=jnp.float32))  # (Tt, d)

        # ---- lang queries -> online softmax over the tiled tgt (vision) axis ----
        m_prev = m_scr[h]                                    # (1, Nl)
        tile_max = jnp.max(s_h, axis=0, keepdims=True)       # (1, Nl)
        m_new = jnp.maximum(m_prev, tile_max)
        alpha = jnp.exp(m_prev - m_new)                      # (1, Nl)
        p_l = jnp.exp(s_h - m_new)                           # (Tt, Nl)
        l_scr[h] = alpha * l_scr[h] + jnp.sum(p_l, axis=0, keepdims=True)
        # acc[:, s] += sum_t vv_h[t, :] * p_l[t, s]   ->  vv_h^T @ p_l  : (d, Nl)
        upd = lax.dot_general(vv_h, p_l,
                              dimension_numbers=(((0,), (0,)), ((), ())),
                              preferred_element_type=jnp.float32)
        acc_scr[h] = alpha * acc_scr[h] + upd
        m_scr[h] = m_new

    # lane-dense full-width store of this tgt tile's vision context
    ov_ref[0] = jnp.concatenate(ctx_v_heads, axis=-1).astype(ov_ref.dtype)

    @pl.when(t == pl.num_programs(1) - 1)
    def _finalize():
        ctx_l_heads = []
        for h in range(num_heads):
            inv_l = pl.reciprocal(l_scr[h], approx=True)     # (1, Nl)
            ctx_l_heads.append(jnp.transpose(acc_scr[h] * inv_l))  # (Nl, d)
        ol_ref[0] = jnp.concatenate(ctx_l_heads, axis=-1).astype(ol_ref.dtype)


def bi_cross_attention(vproj, lproj, add_mask, *, num_heads, head_dim, tgt_tile):
    """vproj: [B, Nv, 2E] ([q|value_v]); lproj: [B, Nl, 2E]; add_mask: [B, 1, Nl]."""
    B, Nv, E2 = vproj.shape
    _, Nl, _ = lproj.shape
    E = E2 // 2
    n_t = Nv // tgt_tile
    kernel = partial(_bi_attention_kernel, num_heads=num_heads, head_dim=head_dim,
                     scale=float(head_dim) ** -0.5)
    return pl.pallas_call(
        kernel,
        out_shape=(jax.ShapeDtypeStruct((B, Nv, E), vproj.dtype),
                   jax.ShapeDtypeStruct((B, Nl, E), vproj.dtype)),
        grid_spec=pltpu.PrefetchScalarGridSpec(
            num_scalar_prefetch=0,
            grid=(B, n_t),
            in_specs=[
                pl.BlockSpec((1, tgt_tile, E2), lambda b, t: (b, t, 0)),
                pl.BlockSpec((1, Nl, E2), lambda b, t: (b, 0, 0)),
                pl.BlockSpec((1, 1, Nl), lambda b, t: (b, 0, 0)),
            ],
            out_specs=[
                pl.BlockSpec((1, tgt_tile, E), lambda b, t: (b, t, 0)),
                pl.BlockSpec((1, Nl, E), lambda b, t: (b, 0, 0)),
            ],
            scratch_shapes=[
                pltpu.VMEM((num_heads, 1, Nl), jnp.float32),        # running max
                pltpu.VMEM((num_heads, 1, Nl), jnp.float32),        # running denom
                pltpu.VMEM((num_heads, head_dim, Nl), jnp.float32),  # running numerator
            ],
        ),
        compiler_params=pltpu.CompilerParams(
            dimension_semantics=("parallel", "arbitrary"),
            vmem_limit_bytes=_VMEM_LIMIT),
    )(vproj, lproj, add_mask)


# ---------------------------------------------------------------------------
# Module wrapper
# ---------------------------------------------------------------------------
class BiAttentionBlockPallas:
    def __init__(self, v_dim, l_dim, embed_dim, num_heads, key,
                 dropout=0.1, drop_path=0.0, init_values=1e-4, tgt_tile=256):
        assert embed_dim % num_heads == 0
        self.v_dim, self.l_dim = v_dim, l_dim
        self.embed_dim, self.num_heads = embed_dim, num_heads
        self.head_dim = embed_dim // num_heads
        self.tgt_tile_target = tgt_tile

        ks = iter(jax.random.split(key, 16))

        def xavier(k, fan_in, fan_out):
            lim = math.sqrt(6.0 / (fan_in + fan_out))
            return jax.random.uniform(k, (fan_in, fan_out), jnp.float32, -lim, lim)

        E = embed_dim
        # LayerNorm params (perturbed from ones/zeros so the test is meaningful)
        self.ln_v_w = 1.0 + 0.1 * jax.random.normal(next(ks), (v_dim,), jnp.float32)
        self.ln_v_b = 0.1 * jax.random.normal(next(ks), (v_dim,), jnp.float32)
        self.ln_l_w = 1.0 + 0.1 * jax.random.normal(next(ks), (l_dim,), jnp.float32)
        self.ln_l_b = 0.1 * jax.random.normal(next(ks), (l_dim,), jnp.float32)

        # projection weights stored transposed: [in, out]
        self.w_v_proj = xavier(next(ks), v_dim, E)
        self.b_v_proj = jnp.zeros((E,), jnp.float32)
        self.w_l_proj = xavier(next(ks), l_dim, E)
        self.b_l_proj = jnp.zeros((E,), jnp.float32)
        self.w_values_v = xavier(next(ks), v_dim, E)
        self.b_values_v = jnp.zeros((E,), jnp.float32)
        self.w_values_l = xavier(next(ks), l_dim, E)
        self.b_values_l = jnp.zeros((E,), jnp.float32)
        self.w_out_v = xavier(next(ks), E, v_dim)
        self.b_out_v = jnp.zeros((v_dim,), jnp.float32)
        self.w_out_l = xavier(next(ks), E, l_dim)
        self.b_out_l = jnp.zeros((l_dim,), jnp.float32)

        self.gamma_v = init_values * jnp.ones((v_dim,), jnp.float32)
        self.gamma_l = init_values * jnp.ones((l_dim,), jnp.float32)

        # fused [q | value] projection weights: one activation read per stream
        self.w_v_cat = jnp.concatenate([self.w_v_proj, self.w_values_v], axis=1)
        self.b_v_cat = jnp.concatenate([self.b_v_proj, self.b_values_v])
        self.w_l_cat = jnp.concatenate([self.w_l_proj, self.w_values_l], axis=1)
        self.b_l_cat = jnp.concatenate([self.b_l_proj, self.b_values_l])

    def __call__(self, visual_features, lang_feature, attention_mask_l=None):
        # permute_and_flatten + concat levels
        sizes, flat = [], []
        for feat in visual_features:
            b, c, h, w = feat.shape
            sizes.append((h, w))
            flat.append(jnp.transpose(feat, (0, 2, 3, 1)).reshape(b, h * w, c))
        visual = jnp.concatenate(flat, axis=1)                  # [B, Nv, v_dim]
        B, Nv, _ = visual.shape
        _, Nl, _ = lang_feature.shape
        E = self.embed_dim

        v_ln = layer_norm(visual.reshape(B * Nv, self.v_dim), self.ln_v_w, self.ln_v_b)
        l_ln = layer_norm(lang_feature.reshape(B * Nl, self.l_dim),
                          self.ln_l_w, self.ln_l_b)

        # fused q/value projections
        vproj = linear(v_ln, self.w_v_cat, self.b_v_cat).reshape(B, Nv, 2 * E)
        lproj = linear(l_ln, self.w_l_cat, self.b_l_cat).reshape(B, Nl, 2 * E)

        if attention_mask_l is None:
            add_mask = jnp.zeros((B, 1, Nl), jnp.float32)
        else:
            m = attention_mask_l.astype(jnp.float32)
            add_mask = jnp.where(m == 0.0, jnp.float32(MASK_FILL), m).reshape(B, 1, Nl)

        tgt_tile = _pick_tile(Nv, self.tgt_tile_target, 8)
        ctx_v, ctx_l = bi_cross_attention(
            vproj, lproj, add_mask,
            num_heads=self.num_heads, head_dim=self.head_dim, tgt_tile=tgt_tile)

        # output projection with fused gamma scale + residual (base = LayerNormed input)
        new_v = linear(ctx_v.reshape(B * Nv, E), self.w_out_v, self.b_out_v,
                       gamma=self.gamma_v, residual=v_ln).reshape(B, Nv, self.v_dim)
        new_l = linear(ctx_l.reshape(B * Nl, E), self.w_out_l, self.b_out_l,
                       gamma=self.gamma_l, residual=l_ln).reshape(B, Nl, self.l_dim)

        # split visual back into per-level [B, C, h, w] maps
        new_v_t = jnp.transpose(new_v, (0, 2, 1))               # [B, v_dim, Nv]
        fusion_visual_features = []
        start = 0
        for (h, w) in sizes:
            lvl = new_v_t[:, :, start:start + h * w].reshape(B, self.v_dim, h, w)
            fusion_visual_features.append(lvl)
            start += h * w
        return fusion_visual_features, new_l


# ---------------------------------------------------------------------------
# Pure-JAX reference (mirrors the PyTorch BiAttentionBlock forward, eval mode)
# ---------------------------------------------------------------------------
def reference_forward(mod, visual_features, lang_feature, attention_mask_l):
    sizes, flat = [], []
    for feat in visual_features:
        b, c, h, w = feat.shape
        sizes.append((h, w))
        flat.append(jnp.transpose(feat, (0, 2, 3, 1)).reshape(b, h * w, c))
    visual = jnp.concatenate(flat, axis=1)
    B, Nv, _ = visual.shape
    _, Nl, _ = lang_feature.shape
    E, nH, d = mod.embed_dim, mod.num_heads, mod.head_dim

    def ln(x, g, bta):
        mu = jnp.mean(x, -1, keepdims=True)
        var = jnp.mean((x - mu) ** 2, -1, keepdims=True)
        return (x - mu) / jnp.sqrt(var + 1e-5) * g + bta

    v = ln(visual, mod.ln_v_w, mod.ln_v_b)
    l = ln(lang_feature, mod.ln_l_w, mod.ln_l_b)

    q = (v @ mod.w_v_proj + mod.b_v_proj) * (d ** -0.5)
    k = l @ mod.w_l_proj + mod.b_l_proj
    vv = v @ mod.w_values_v + mod.b_values_v
    vl = l @ mod.w_values_l + mod.b_values_l

    def heads(x):
        B_, S_, _ = x.shape
        return jnp.transpose(x.reshape(B_, S_, nH, d), (0, 2, 1, 3))

    qh, kh, vvh, vlh = map(heads, (q, k, vv, vl))
    w_att = jnp.einsum('bhtd,bhsd->bhts', qh, kh)
    w_att = jnp.clip(w_att, -MAX_CLAMP_VALUE, MAX_CLAMP_VALUE)

    w_T = jnp.swapaxes(w_att, 2, 3)
    w_l = w_T - jnp.max(w_T, axis=-1, keepdims=True)
    w_l = jnp.clip(w_l, -MAX_CLAMP_VALUE, MAX_CLAMP_VALUE)
    p_l = jax.nn.softmax(w_l, axis=-1)

    if attention_mask_l is not None:
        m = attention_mask_l.astype(jnp.float32)
        add = jnp.where(m == 0.0, jnp.float32(MASK_FILL), m)[:, None, None, :]
        w_att = w_att + add
    p_v = jax.nn.softmax(w_att, axis=-1)

    out_v = jnp.einsum('bhts,bhsd->bhtd', p_v, vlh)
    out_l = jnp.einsum('bhst,bhtd->bhsd', p_l, vvh)
    ctx_v = jnp.transpose(out_v, (0, 2, 1, 3)).reshape(B, Nv, E)
    ctx_l = jnp.transpose(out_l, (0, 2, 1, 3)).reshape(B, Nl, E)

    new_v = v + mod.gamma_v * (ctx_v @ mod.w_out_v + mod.b_out_v)
    new_l = l + mod.gamma_l * (ctx_l @ mod.w_out_l + mod.b_out_l)

    new_v_t = jnp.transpose(new_v, (0, 2, 1))
    outs, start = [], 0
    for (h, w) in sizes:
        outs.append(new_v_t[:, :, start:start + h * w].reshape(B, mod.v_dim, h, w))
        start += h * w
    return outs, new_l


if __name__ == "__main__":
    key = jax.random.PRNGKey(0)
    kp, k1, k2, k3, k4 = jax.random.split(key, 5)

    B = 2
    v_dim, l_dim, embed_dim, num_heads = 32, 32, 32, 4
    # two visual levels: 8x8 and 4x4 -> Nv = 80 vision tokens; Nl = 8 text tokens
    feats = [jax.random.normal(k1, (B, v_dim, 8, 8), jnp.float32),
             jax.random.normal(k2, (B, v_dim, 4, 4), jnp.float32)]
    Nl = 8
    lang = jax.random.normal(k3, (B, Nl, l_dim), jnp.float32)
    mask_bits = (jax.random.uniform(k4, (B, Nl)) > 0.25).astype(jnp.float32)

    # init_values bumped (default 1e-4) and a small tgt tile so the residual does not
    # swamp the attention path and the multi-tile online-softmax path is exercised.
    mod = BiAttentionBlockPallas(v_dim, l_dim, embed_dim, num_heads, kp,
                                 init_values=0.5, tgt_tile=16)

    outs, new_lang = mod(feats, lang, mask_bits)
    outs = [jax.block_until_ready(o) for o in outs]
    new_lang = jax.block_until_ready(new_lang)

    ref_outs, ref_lang = reference_forward(mod, feats, lang, mask_bits)
    for o, r in zip(outs, ref_outs):
        assert o.shape == r.shape
        assert jnp.allclose(o, r, atol=2e-3, rtol=2e-3), "vision output mismatch"
    assert new_lang.shape == ref_lang.shape
    assert jnp.allclose(new_lang, ref_lang, atol=2e-3, rtol=2e-3), "lang output mismatch"

    print("KERNEL_OK")
</pallas_src>

<mosaic_0001>
module attributes {stable_mosaic.version = 11 : i64} {
  func.func @_layer_norm_kernel(%arg0: i32, %arg1: memref<160x32xf32, #tpu.memory_space<vmem>>, %arg2: memref<1x32xf32, #tpu.memory_space<vmem>>, %arg3: memref<1x32xf32, #tpu.memory_space<vmem>>, %arg4: memref<160x32xf32, #tpu.memory_space<vmem>>) attributes {dimension_semantics = [#tpu.dimension_semantics<parallel>], iteration_bounds = array<i64: 1>, scalar_prefetch = 0 : i64, scratch_operands = 0 : i64, tpu.core_type = #tpu.core_type<tc>, window_params = [{transform_indices = @transform_0, window_bounds = array<i64: 160, 32>}, {pipeline_mode = #tpu.pipeline_mode<synchronous>, transform_indices = @transform_1, window_bounds = array<i64: 1, 32>}, {pipeline_mode = #tpu.pipeline_mode<synchronous>, transform_indices = @transform_2, window_bounds = array<i64: 1, 32>}, {transform_indices = @transform_3, window_bounds = array<i64: 160, 32>}]} {
    %c0 = arith.constant 0 : index
    %c0_0 = arith.constant 0 : index
    %0 = vector.load %arg1[%c0, %c0_0] : memref<160x32xf32, #tpu.memory_space<vmem>>, vector<160x32xf32>
    %cst = arith.constant dense<0.000000e+00> : vector<160xf32>
    %1 = vector.multi_reduction <add>, %0, %cst [1] : vector<160x32xf32> to vector<160xf32>
    %2 = vector.shape_cast %1 : vector<160xf32> to vector<160x1xf32>
    %cst_1 = arith.constant 3.200000e+01 : f32
    %3 = vector.broadcast %cst_1 : f32 to vector<160x1xf32>
    %4 = arith.divf %2, %3 : vector<160x1xf32>
    %5 = vector.broadcast %4 : vector<160x1xf32> to vector<160x32xf32>
    %6 = arith.subf %0, %5 : vector<160x32xf32>
    %7 = arith.mulf %6, %6 : vector<160x32xf32>
    %cst_2 = arith.constant dense<0.000000e+00> : vector<160xf32>
    %8 = vector.multi_reduction <add>, %7, %cst_2 [1] : vector<160x32xf32> to vector<160xf32>
    %9 = vector.shape_cast %8 : vector<160xf32> to vector<160x1xf32>
    %cst_3 = arith.constant 3.200000e+01 : f32
    %10 = vector.broadcast %cst_3 : f32 to vector<160x1xf32>
    %11 = arith.divf %9, %10 : vector<160x1xf32>
    %cst_4 = arith.constant 9.99999974E-6 : f32
    %12 = vector.broadcast %cst_4 : f32 to vector<160x1xf32>
    %13 = arith.addf %11, %12 : vector<160x1xf32>
    %14 = math.rsqrt %13 : vector<160x1xf32>
    %15 = vector.broadcast %14 : vector<160x1xf32> to vector<160x32xf32>
    %16 = arith.mulf %6, %15 : vector<160x32xf32>
    %c0_5 = arith.constant 0 : index
    %c0_6 = arith.constant 0 : index
    %17 = vector.load %arg2[%c0_5, %c0_6] : memref<1x32xf32, #tpu.memory_space<vmem>>, vector<1x32xf32>
    %18 = vector.broadcast %17 : vector<1x32xf32> to vector<160x32xf32>
    %19 = arith.mulf %16, %18 : vector<160x32xf32>
    %c0_7 = arith.constant 0 : index
    %c0_8 = arith.constant 0 : index
    %20 = vector.load %arg3[%c0_7, %c0_8] : memref<1x32xf32, #tpu.memory_space<vmem>>, vector<1x32xf32>
    %21 = vector.broadcast %20 : vector<1x32xf32> to vector<160x32xf32>
    %22 = arith.addf %19, %21 : vector<160x32xf32>
    %c0_9 = arith.constant 0 : index
    %c0_10 = arith.constant 0 : index
    %23 = vector.load %arg4[%c0_9, %c0_10] : memref<160x32xf32, #tpu.memory_space<vmem>>, vector<160x32xf32>
    tpu.vector_store %arg4[%c0_9, %c0_10], %22 {strides = array<i32>} : memref<160x32xf32, #tpu.memory_space<vmem>>, vector<160x32xf32>,
    return
  }
  func.func @transform_0(%arg0: i32) -> (i32, i32) {
    %c0_i32 = arith.constant 0 : i32
    %c0_i32_0 = arith.constant 0 : i32
    return %arg0, %c0_i32 : i32, i32
  }
  func.func @transform_1(%arg0: i32) -> (i32, i32) {
    %c0_i32 = arith.constant 0 : i32
    %c0_i32_0 = arith.constant 0 : i32
    %c0_i32_1 = arith.constant 0 : i32
    return %c0_i32, %c0_i32_0 : i32, i32
  }
  func.func @transform_2(%arg0: i32) -> (i32, i32) {
    %c0_i32 = arith.constant 0 : i32
    %c0_i32_0 = arith.constant 0 : i32
    %c0_i32_1 = arith.constant 0 : i32
    return %c0_i32, %c0_i32_0 : i32, i32
  }
  func.func @transform_3(%arg0: i32) -> (i32, i32) {
    %c0_i32 = arith.constant 0 : i32
    %c0_i32_0 = arith.constant 0 : i32
    return %arg0, %c0_i32 : i32, i32
  }
}

</mosaic_0001>

<bundles_post_ra>
// kernel: tpu_custom_call.1
= control target key start
LH: loop header
LB: loop body
LE: loop exit
PB: predicated region body
PF: predicated region fallthrough
CT: control target
= control target key end

     0   :  { %vm34_vm0 = vcmask 261120   ;;  %s846_s0 = inlined_call_operand.vmem [shape: f32[160,32], index: 0, kind: input, shape index: {}]   ;;  %s847_s1 = inlined_call_operand.vmem [shape: f32[1,32], index: 1, kind: input, shape index: {}]   ;;  %s848_s2 = inlined_call_operand.vmem [shape: f32[1,32], index: 2, kind: input, shape index: {}]   ;;  %s849_s3 = inlined_call_operand.vmem [shape: f32[160,32], index: 3, kind: output, shape index: {}]  }
   0x1   :  { %v439_v0 = vld [vmem:[%s846_s0] sm:$0xff]  ;;  %v444_v1 = vld [vmem:[%s846_s0 + $0x10] sm:$0xff]  ;;  %v449_v2 = vld [vmem:[%s846_s0 + $0x8] sm:$0xff] }
   0x2   :  { %v35_v3 = vsel %vm34_vm0, %v439_v0, 0.0  ;;  %v41_v4 = vsel %vm34_vm0, %v444_v1, 0.0  ;;  %v458_v5 = vld [vmem:[%s846_s0 + $0x18] sm:$0xff]  ;;  %v38_v6 = vsel %vm34_vm0, %v449_v2, 0.0  ;;  %v467_v8 = vld [vmem:[%s846_s0 + $0x20] sm:$0xff]  ;;  %v472_v9 = vld [vmem:[%s846_s0 + $0x28] sm:$0xff] }
   0x3   :  { %36 = vadd.xlane.f32.xlu0 %v35_v3  ;;  %42 = vadd.xlane.f32.xlu1 %v41_v4  ;;  %v44_v7 = vsel %vm34_vm0, %v458_v5, 0.0  ;;  %v47_v10 = vsel %vm34_vm0, %v467_v8, 0.0  ;;  %v50_v11 = vsel %vm34_vm0, %v472_v9, 0.0  ;;  %v481_v12 = vld [vmem:[%s846_s0 + $0x30] sm:$0xff]  ;;  %v486_v13 = vld [vmem:[%s846_s0 + $0x38] sm:$0xff]  ;;  %v495_v16 = vld [vmem:[%s846_s0 + $0x40] sm:$0xff] }
   0x4   :  { %v53_v14 = vsel %vm34_vm0, %v481_v12, 0.0  ;;  %v56_v15 = vsel %vm34_vm0, %v486_v13, 0.0  ;;  %v500_v17 = vld [vmem:[%s846_s0 + $0x48] sm:$0xff]  ;;  %v59_v18 = vsel %vm34_vm0, %v495_v16, 0.0  ;;  %v509_v20 = vld [vmem:[%s846_s0 + $0x50] sm:$0xff]  ;;  %v514_v21 = vld [vmem:[%s846_s0 + $0x58] sm:$0xff] }
   0x5   :  { %v62_v19 = vsel %vm34_vm0, %v500_v17, 0.0  ;;  %v65_v22 = vsel %vm34_vm0, %v509_v20, 0.0  ;;  %v68_v23 = vsel %vm34_vm0, %v514_v21, 0.0  ;;  %v523_v24 = vld [vmem:[%s846_s0 + $0x60] sm:$0xff]  ;;  %v528_v25 = vld [vmem:[%s846_s0 + $0x68] sm:$0xff]  ;;  %v537_v28 = vld [vmem:[%s846_s0 + $0x70] sm:$0xff] }
   0x6   :  { %v71_v26 = vsel %vm34_vm0, %v523_v24, 0.0  ;;  %v74_v27 = vsel %vm34_vm0, %v528_v25, 0.0  ;;  %v542_v29 = vld [vmem:[%s846_s0 + $0x78] sm:$0xff]  ;;  %v77_v30 = vsel %vm34_vm0, %v537_v28, 0.0  ;;  %v551_v32 = vld [vmem:[%s846_s0 + $0x80] sm:$0xff]  ;;  %v556_v33 = vld [vmem:[%s846_s0 + $0x88] sm:$0xff] }
   0x7   :  { %39 = vadd.xlane.f32.xlu0 %v38_v6  ;;  %45 = vadd.xlane.f32.xlu1 %v44_v7  ;;  %v80_v31 = vsel %vm34_vm0, %v542_v29, 0.0  ;;  %v83_v34 = vsel %vm34_vm0, %v551_v32, 0.0  ;;  %v86_v35 = vsel %vm34_vm0, %v556_v33, 0.0  ;;  %v565_v36 = vld [vmem:[%s846_s0 + $0x90] sm:$0xff]  ;;  %v570_v37 = vld [vmem:[%s846_s0 + $0x98] sm:$0xff] }
   0x8   :  { %v89_v38 = vsel %vm34_vm0, %v565_v36, 0.0  ;;  %v92_v39 = vsel %vm34_vm0, %v570_v37, 0.0 }
   0xb   :  { %48 = vadd.xlane.f32.xlu0 %v47_v10  ;;  %51 = vadd.xlane.f32.xlu1 %v50_v11 }
   0xf   :  { %54 = vadd.xlane.f32.xlu0 %v53_v14  ;;  %57 = vadd.xlane.f32.xlu1 %v56_v15 }
  0x13   :  { %60 = vadd.xlane.f32.xlu0 %v59_v18  ;;  %63 = vadd.xlane.f32.xlu1 %v62_v19 }
  0x17   :  { %66 = vadd.xlane.f32.xlu0 %v65_v22  ;;  %69 = vadd.xlane.f32.xlu1 %v68_v23 }
  0x1b   :  { %72 = vadd.xlane.f32.xlu0 %v71_v26  ;;  %75 = vadd.xlane.f32.xlu1 %v74_v27 }
  0x1f   :  { %78 = vadd.xlane.f32.xlu0 %v77_v30  ;;  %81 = vadd.xlane.f32.xlu1 %v80_v31 }
  0x23   :  { %84 = vadd.xlane.f32.xlu0 %v83_v34  ;;  %87 = vadd.xlane.f32.xlu1 %v86_v35 }
  0x27   :  { %90 = vadd.xlane.f32.xlu0 %v89_v38  ;;  %93 = vadd.xlane.f32.xlu1 %v92_v39 }
  0x8c   :  { %v37_v40 = vpop.xlane.xlu0 %36  ;;  %v43_v41 = vpop.xlane.xlu1 %42 }
  0x8d   :  { %v96_v42 = vmul.f32 0.03125, %v37_v40  ;;  %v98_v43 = vmul.f32 0.03125, %v43_v41 }
  0x8f   :  { %v577_v44 = vsub.f32 %v439_v0, %v96_v42  ;;  %v580_v45 = vsub.f32 %v444_v1, %v98_v43 }
  0x90   :  { %v40_v46 = vpop.xlane.xlu0 %39  ;;  %v46_v47 = vpop.xlane.xlu1 %45 }
  0x91   :  { %v97_v48 = vmul.f32 0.03125, %v40_v46  ;;  %v99_v49 = vmul.f32 0.03125, %v46_v47  ;;  %v136_v50 = vmul.f32 %v577_v44, %v577_v44  ;;  %v138_v51 = vmul.f32 %v580_v45, %v580_v45 }
  0x93   :  { %v587_v52 = vsub.f32 %v449_v2, %v97_v48  ;;  %v590_v53 = vsub.f32 %v458_v5, %v99_v49  ;;  %v156_v54 = vsel %vm34_vm0, %v136_v50, 0.0  ;;  %v162_v57 = vsel %vm34_vm0, %v138_v51, 0.0 }
  0x94   :  { %157 = vadd.xlane.f32.xlu0 %v156_v54  ;;  %v49_v55 = vpop.xlane.xlu0 %48  ;;  %v52_v56 = vpop.xlane.xlu1 %51 }
  0x95   :  { %v100_v58 = vmul.f32 0.03125, %v49_v55  ;;  %v101_v59 = vmul.f32 0.03125, %v52_v56  ;;  %v137_v60 = vmul.f32 %v587_v52, %v587_v52  ;;  %v139_v61 = vmul.f32 %v590_v53, %v590_v53 }
  0x97   :  { %v599_v62 = vsub.f32 %v467_v8, %v100_v58  ;;  %v602_v63 = vsub.f32 %v472_v9, %v101_v59  ;;  %v159_v0 = vsel %vm34_vm0, %v137_v60, 0.0  ;;  %v165_v3 = vsel %vm34_vm0, %v139_v61, 0.0 }
  0x98   :  { %163 = vadd.xlane.f32.xlu0 %v162_v57  ;;  %160 = vadd.xlane.f32.xlu1 %v159_v0  ;;  %v55_v1 = vpop.xlane.xlu0 %54  ;;  %v58_v2 = vpop.xlane.xlu1 %57 }
  0x99   :  { %v102_v4 = vmul.f32 0.03125, %v55_v1  ;;  %v103_v5 = vmul.f32 0.03125, %v58_v2  ;;  %v140_v6 = vmul.f32 %v599_v62, %v599_v62  ;;  %v141_v7 = vmul.f32 %v602_v63, %v602_v63 }
  0x9b   :  { %v611_v8 = vsub.f32 %v481_v12, %v102_v4  ;;  %v614_v9 = vsub.f32 %v486_v13, %v103_v5  ;;  %v168_v10 = vsel %vm34_vm0, %v140_v6, 0.0  ;;  %v171_v15 = vsel %vm34_vm0, %v141_v7, 0.0 }
  0x9c   :  { %166 = vadd.xlane.f32.xlu1 %v165_v3  ;;  %169 = vadd.xlane.f32.xlu0 %v168_v10  ;;  %v61_v11 = vpop.xlane.xlu0 %60  ;;  %v64_v14 = vpop.xlane.xlu1 %63 }
  0x9d   :  { %v104_v18 = vmul.f32 0.03125, %v61_v11  ;;  %v105_v19 = vmul.f32 0.03125, %v64_v14  ;;  %v142_v22 = vmul.f32 %v611_v8, %v611_v8  ;;  %v143_v12 = vmul.f32 %v614_v9, %v614_v9 }
  0x9f   :  { %v623_v23 = vsub.f32 %v495_v16, %v104_v18  ;;  %v626_v13 = vsub.f32 %v500_v17, %v105_v19  ;;  %v174_v26 = vsel %vm34_vm0, %v142_v22, 0.0  ;;  %v177_v31 = vsel %vm34_vm0, %v143_v12, 0.0 }
  0xa0   :  { %172 = vadd.xlane.f32.xlu1 %v171_v15  ;;  %175 = vadd.xlane.f32.xlu0 %v174_v26  ;;  %v67_v27 = vpop.xlane.xlu0 %66  ;;  %v70_v30 = vpop.xlane.xlu1 %69 }
  0xa1   :  { %v106_v34 = vmul.f32 0.03125, %v67_v27  ;;  %v107_v35 = vmul.f32 0.03125, %v70_v30  ;;  %v144_v38 = vmul.f32 %v623_v23, %v623_v23  ;;  %v145_v16 = vmul.f32 %v626_v13, %v626_v13 }
  0xa3   :  { %v635_v39 = vsub.f32 %v509_v20, %v106_v34  ;;  %v638_v17 = vsub.f32 %v514_v21, %v107_v35  ;;  %v180_v40 = vsel %vm34_vm0, %v144_v38, 0.0  ;;  %v183_v43 = vsel %vm34_vm0, %v145_v16, 0.0 }
  0xa4   :  { %178 = vadd.xlane.f32.xlu1 %v177_v31  ;;  %181 = vadd.xlane.f32.xlu0 %v180_v40  ;;  %v73_v41 = vpop.xlane.xlu0 %72  ;;  %v76_v42 = vpop.xlane.xlu1 %75 }
  0xa5   :  { %v108_v46 = vmul.f32 0.03125, %v73_v41  ;;  %v109_v47 = vmul.f32 0.03125, %v76_v42  ;;  %v146_v48 = vmul.f32 %v635_v39, %v635_v39  ;;  %v147_v20 = vmul.f32 %v638_v17, %v638_v17 }
  0xa7   :  { %v647_v49 = vsub.f32 %v523_v24, %v108_v46  ;;  %v650_v21 = vsub.f32 %v528_v25, %v109_v47  ;;  %v186_v50 = vsel %vm34_vm0, %v146_v48, 0.0  ;;  %v189_v55 = vsel %vm34_vm0, %v147_v20, 0.0 }
  0xa8   :  { %184 = vadd.xlane.f32.xlu1 %v183_v43  ;;  %187 = vadd.xlane.f32.xlu0 %v186_v50  ;;  %v79_v51 = vpop.xlane.xlu0 %78  ;;  %v82_v54 = vpop.xlane.xlu1 %81 }
  0xa9   :  { %v110_v56 = vmul.f32 0.03125, %v79_v51  ;;  %v111_v57 = vmul.f32 0.03125, %v82_v54  ;;  %v148_v58 = vmul.f32 %v647_v49, %v647_v49  ;;  %v149_v24 = vmul.f32 %v650_v21, %v650_v21 }
  0xab   :  { %v659_v59 = vsub.f32 %v537_v28, %v110_v56  ;;  %v662_v25 = vsub.f32 %v542_v29, %v111_v57  ;;  %v192_v60 = vsel %vm34_vm0, %v148_v58, 0.0  ;;  %v195_v1 = vsel %vm34_vm0, %v149_v24, 0.0 }
  0xac   :  { %190 = vadd.xlane.f32.xlu1 %v189_v55  ;;  %193 = vadd.xlane.f32.xlu0 %v192_v60  ;;  %v85_v61 = vpop.xlane.xlu0 %84  ;;  %v88_v0 = vpop.xlane.xlu1 %87 }
  0xad   :  { %v112_v2 = vmul.f32 0.03125, %v85_v61  ;;  %v113_v3 = vmul.f32 0.03125, %v88_v0  ;;  %v150_v4 = vmul.f32 %v659_v59, %v659_v59  ;;  %v151_v28 = vmul.f32 %v662_v25, %v662_v25 }
  0xaf   :  { %v671_v5 = vsub.f32 %v551_v32, %v112_v2  ;;  %v674_v29 = vsub.f32 %v556_v33, %v113_v3  ;;  %v198_v6 = vsel %vm34_vm0, %v150_v4, 0.0  ;;  %v201_v11 = vsel %vm34_vm0, %v151_v28, 0.0  ;;  %v699_v2 = vld [vmem:[%s847_s1] ss:$0 sm:$0xff] }
  0xb0   :  { %196 = vadd.xlane.f32.xlu1 %v195_v1  ;;  %199 = vadd.xlane.f32.xlu0 %v198_v6  ;;  %v91_v7 = vpop.xlane.xlu0 %90  ;;  %v94_v10 = vpop.xlane.xlu1 %93  ;;  %v705_v6 = vld [vmem:[%s848_s2] ss:$0 sm:$0xff] }
  0xb1   :  { %v114_v14 = vmul.f32 0.03125, %v91_v7  ;;  %v115_v15 = vmul.f32 0.03125, %v94_v10  ;;  %v152_v18 = vmul.f32 %v671_v5, %v671_v5  ;;  %v153_v32 = vmul.f32 %v674_v29, %v674_v29 }
  0xb3   :  { %v683_v19 = vsub.f32 %v565_v36, %v114_v14  ;;  %v686_v33 = vsub.f32 %v570_v37, %v115_v15  ;;  %v204_v22 = vsel %vm34_vm0, %v152_v18, 0.0  ;;  %v207_v12 = vsel %vm34_vm0, %v153_v32, 0.0 }
  0xb4   :  { %202 = vadd.xlane.f32.xlu1 %v201_v11  ;;  %205 = vadd.xlane.f32.xlu0 %v204_v22 }
  0xb5   :  { %v154_v26 = vmul.f32 %v683_v19, %v683_v19  ;;  %v155_v27 = vmul.f32 %v686_v33, %v686_v33 }
  0xb7   :  { %v210_v30 = vsel %vm34_vm0, %v154_v26, 0.0  ;;  %v213_v36 = vsel %vm34_vm0, %v155_v27, 0.0 }
  0xb8   :  { %208 = vadd.xlane.f32.xlu1 %v207_v12  ;;  %211 = vadd.xlane.f32.xlu0 %v210_v30 }
  0xbc   :  { %214 = vadd.xlane.f32.xlu1 %v213_v36 }
 0x11d   :  { %v158_v37 = vpop.xlane.xlu0 %157 }
 0x11e   :  { %v216_v31 = vmul.f32 0.03125, %v158_v37 }
 0x120   :  { %v236_v34 = vadd.f32 1e-05, %v216_v31 }
 0x121   :  { %v161_v35 = vpop.xlane.xlu1 %160  ;;  %v164_v38 = vpop.xlane.xlu0 %163 }
 0x122   :  { %376 = vrsqrt.f32 %v236_v34  ;;  %v217_v16 = vmul.f32 0.03125, %v161_v35  ;;  %v218_v40 = vmul.f32 0.03125, %v164_v38 }
 0x124   :  { %v237_v41 = vadd.f32 1e-05, %v217_v16  ;;  %v238_v42 = vadd.f32 1e-05, %v218_v40 }
 0x125   :  { %v167_v43 = vpop.xlane.xlu1 %166  ;;  %v170_v46 = vpop.xlane.xlu0 %169 }
 0x126   :  { %378 = vrsqrt.f32 %v237_v41  ;;  %v219_v47 = vmul.f32 0.03125, %v167_v43  ;;  %v220_v48 = vmul.f32 0.03125, %v170_v46 }
 0x127   :  { %380 = vrsqrt.f32 %v238_v42 }
 0x128   :  { %v239_v20 = vadd.f32 1e-05, %v219_v47  ;;  %v240_v50 = vadd.f32 1e-05, %v220_v48 }
 0x129   :  { %v173_v51 = vpop.xlane.xlu1 %172  ;;  %v176_v54 = vpop.xlane.xlu0 %175 }
 0x12a   :  { %382 = vrsqrt.f32 %v239_v20  ;;  %v221_v55 = vmul.f32 0.03125, %v173_v51  ;;  %v222_v56 = vmul.f32 0.03125, %v176_v54 }
 0x12b   :  { %384 = vrsqrt.f32 %v240_v50 }
 0x12c   :  { %v241_v57 = vadd.f32 1e-05, %v221_v55  ;;  %v242_v58 = vadd.f32 1e-05, %v222_v56 }
 0x12d   :  { %v179_v24 = vpop.xlane.xlu1 %178  ;;  %v182_v60 = vpop.xlane.xlu0 %181 }
 0x12e   :  { %386 = vrsqrt.f32 %v241_v57  ;;  %v223_v61 = vmul.f32 0.03125, %v179_v24  ;;  %v224_v0 = vmul.f32 0.03125, %v182_v60 }
 0x12f   :  { %v377_v1 = vpop.eup %376  ;;  %388 = vrsqrt.f32 %v242_v58 }
 0x130   :  { %v276_v3 = vmul.f32 %v377_v1, %v577_v44  ;;  %v243_v4 = vadd.f32 1e-05, %v223_v61  ;;  %v244_v28 = vadd.f32 1e-05, %v224_v0 }
 0x131   :  { %v185_v7 = vpop.xlane.xlu1 %184  ;;  %v188_v10 = vpop.xlane.xlu0 %187 }
 0x132   :  { %v303_v11 = vmul.f32 %v699_v2, %v276_v3  ;;  %390 = vrsqrt.f32 %v243_v4  ;;  %v225_v14 = vmul.f32 0.03125, %v185_v7  ;;  %v226_v15 = vmul.f32 0.03125, %v188_v10 }
 0x133   :  { %v379_v18 = vpop.eup %378  ;;  %392 = vrsqrt.f32 %v244_v28 }
 0x134   :  { %v381_v32 = vpop.eup %380  ;;  %v330_v22 = vadd.f32 %v705_v6, %v303_v11  ;;  %v277_v44 = vmul.f32 %v379_v18, %v587_v52  ;;  %v245_v12 = vadd.f32 1e-05, %v225_v14  ;;  %v246_v26 = vadd.f32 1e-05, %v226_v15 }
 0x135   :  { %v278_v27 = vmul.f32 %v381_v32, %v580_v45  ;;  %v191_v30 = vpop.xlane.xlu1 %190  ;;  %v194_v36 = vpop.xlane.xlu0 %193 }
 0x136   :  { %350 = vst.msk [vmem:[%s849_s3] sm:$0xff] %vm34_vm0, %v330_v22  ;;  %v304_v37 = vmul.f32 %v699_v2, %v277_v44  ;;  %394 = vrsqrt.f32 %v245_v12  ;;  %v227_v31 = vmul.f32 0.03125, %v191_v30  ;;  %v228_v34 = vmul.f32 0.03125, %v194_v36 }
 0x137   :  { %v383_v35 = vpop.eup %382  ;;  %v305_v38 = vmul.f32 %v699_v2, %v278_v27  ;;  %396 = vrsqrt.f32 %v246_v26 }
 0x138   :  { %v385_v52 = vpop.eup %384  ;;  %v331_v16 = vadd.f32 %v705_v6, %v304_v37  ;;  %v279_v45 = vmul.f32 %v383_v35, %v590_v53  ;;  %v247_v40 = vadd.f32 1e-05, %v227_v31  ;;  %v248_v41 = vadd.f32 1e-05, %v228_v34 }
 0x139   :  { %v332_v42 = vadd.f32 %v705_v6, %v305_v38  ;;  %v280_v43 = vmul.f32 %v385_v52, %v599_v62  ;;  %v197_v46 = vpop.xlane.xlu1 %196  ;;  %v200_v47 = vpop.xlane.xlu0 %199 }
 0x13a   :  { %351 = vst.msk [vmem:[%s849_s3 + $0x8] sm:$0xff] %vm34_vm0, %v331_v16  ;;  %v306_v48 = vmul.f32 %v699_v2, %v279_v45  ;;  %398 = vrsqrt.f32 %v247_v40  ;;  %v229_v20 = vmul.f32 0.03125, %v197_v46  ;;  %v230_v50 = vmul.f32 0.03125, %v200_v47 }
 0x13b   :  { %v387_v51 = vpop.eup %386  ;;  %352 = vst.msk [vmem:[%s849_s3 + $0x10] sm:$0xff] %vm34_vm0, %v332_v42  ;;  %v307_v53 = vmul.f32 %v699_v2, %v280_v43  ;;  %400 = vrsqrt.f32 %v248_v41 }
 0x13c   :  { %v389_v62 = vpop.eup %388  ;;  %v333_v54 = vadd.f32 %v705_v6, %v306_v48  ;;  %v281_v55 = vmul.f32 %v387_v51, %v602_v63  ;;  %v249_v56 = vadd.f32 1e-05, %v229_v20  ;;  %v250_v57 = vadd.f32 1e-05, %v230_v50 }
 0x13d   :  { %v334_v58 = vadd.f32 %v705_v6, %v307_v53  ;;  %v282_v24 = vmul.f32 %v389_v62, %v611_v8  ;;  %v203_v60 = vpop.xlane.xlu1 %202  ;;  %v206_v61 = vpop.xlane.xlu0 %205 }
 0x13e   :  { %353 = vst.msk [vmem:[%s849_s3 + $0x18] sm:$0xff] %vm34_vm0, %v333_v54  ;;  %v308_v0 = vmul.f32 %v699_v2, %v281_v55  ;;  %402 = vrsqrt.f32 %v249_v56  ;;  %v231_v1 = vmul.f32 0.03125, %v203_v60  ;;  %v232_v3 = vmul.f32 0.03125, %v206_v61 }
 0x13f   :  { %v391_v4 = vpop.eup %390  ;;  %354 = vst.msk [vmem:[%s849_s3 + $0x20] sm:$0xff] %vm34_vm0, %v334_v58  ;;  %v309_v63 = vmul.f32 %v699_v2, %v282_v24  ;;  %404 = vrsqrt.f32 %v250_v57 }
 0x140   :  { %v393_v8 = vpop.eup %392  ;;  %v335_v28 = vadd.f32 %v705_v6, %v308_v0  ;;  %v283_v7 = vmul.f32 %v391_v4, %v614_v9  ;;  %v251_v10 = vadd.f32 1e-05, %v231_v1  ;;  %v252_v11 = vadd.f32 1e-05, %v232_v3 }
 0x141   :  { %v336_v14 = vadd.f32 %v705_v6, %v309_v63  ;;  %v284_v15 = vmul.f32 %v393_v8, %v623_v23  ;;  %v209_v18 = vpop.xlane.xlu1 %208  ;;  %v212_v32 = vpop.xlane.xlu0 %211 }
 0x142   :  { %355 = vst.msk [vmem:[%s849_s3 + $0x28] sm:$0xff] %vm34_vm0, %v335_v28  ;;  %v310_v22 = vmul.f32 %v699_v2, %v283_v7  ;;  %406 = vrsqrt.f32 %v251_v10  ;;  %v233_v44 = vmul.f32 0.03125, %v209_v18  ;;  %v234_v12 = vmul.f32 0.03125, %v212_v32 }
 0x143   :  { %v395_v26 = vpop.eup %394  ;;  %356 = vst.msk [vmem:[%s849_s3 + $0x30] sm:$0xff] %vm34_vm0, %v336_v14  ;;  %v311_v9 = vmul.f32 %v699_v2, %v284_v15  ;;  %408 = vrsqrt.f32 %v252_v11 }
 0x144   :  { %v397_v23 = vpop.eup %396  ;;  %v337_v27 = vadd.f32 %v705_v6, %v310_v22  ;;  %v285_v30 = vmul.f32 %v395_v26, %v626_v13  ;;  %v253_v36 = vadd.f32 1e-05, %v233_v44  ;;  %v254_v37 = vadd.f32 1e-05, %v234_v12 }
 0x145   :  { %v338_v31 = vadd.f32 %v705_v6, %v311_v9  ;;  %v286_v34 = vmul.f32 %v397_v23, %v635_v39  ;;  %v215_v35 = vpop.xlane.xlu1 %214 }
 0x146   :  { %357 = vst.msk [vmem:[%s849_s3 + $0x38] sm:$0xff] %vm34_vm0, %v337_v27  ;;  %v312_v38 = vmul.f32 %v699_v2, %v285_v30  ;;  %410 = vrsqrt.f32 %v253_v36  ;;  %v235_v52 = vmul.f32 0.03125, %v215_v35 }
 0x147   :  { %v399_v16 = vpop.eup %398  ;;  %358 = vst.msk [vmem:[%s849_s3 + $0x40] sm:$0xff] %vm34_vm0, %v338_v31  ;;  %v313_v13 = vmul.f32 %v699_v2, %v286_v34  ;;  %412 = vrsqrt.f32 %v254_v37 }
 0x148   :  { %v401_v39 = vpop.eup %400  ;;  %v339_v45 = vadd.f32 %v705_v6, %v312_v38  ;;  %v287_v40 = vmul.f32 %v399_v16, %v638_v17  ;;  %v255_v41 = vadd.f32 1e-05, %v235_v52 }
 0x149   :  { %v340_v42 = vadd.f32 %v705_v6, %v313_v13  ;;  %v288_v43 = vmul.f32 %v401_v39, %v647_v49 }
 0x14a   :  { %359 = vst.msk [vmem:[%s849_s3 + $0x48] sm:$0xff] %vm34_vm0, %v339_v45  ;;  %v314_v46 = vmul.f32 %v699_v2, %v287_v40  ;;  %414 = vrsqrt.f32 %v255_v41 }
 0x14b   :  { %v403_v47 = vpop.eup %402  ;;  %360 = vst.msk [vmem:[%s849_s3 + $0x50] sm:$0xff] %vm34_vm0, %v340_v42  ;;  %v315_v17 = vmul.f32 %v699_v2, %v288_v43 }
 0x14c   :  { %v405_v48 = vpop.eup %404  ;;  %v341_v20 = vadd.f32 %v705_v6, %v314_v46  ;;  %v289_v49 = vmul.f32 %v403_v47, %v650_v21 }
 0x14d   :  { %v342_v50 = vadd.f32 %v705_v6, %v315_v17  ;;  %v290_v51 = vmul.f32 %v405_v48, %v659_v59 }
 0x14e   :  { %361 = vst.msk [vmem:[%s849_s3 + $0x58] sm:$0xff] %vm34_vm0, %v341_v20  ;;  %v316_v53 = vmul.f32 %v699_v2, %v289_v49 }
 0x14f   :  { %v407_v62 = vpop.eup %406  ;;  %362 = vst.msk [vmem:[%s849_s3 + $0x60] sm:$0xff] %vm34_vm0, %v342_v50  ;;  %v317_v54 = vmul.f32 %v699_v2, %v290_v51 }
 0x150   :  { %v409_v21 = vpop.eup %408  ;;  %v343_v55 = vadd.f32 %v705_v6, %v316_v53  ;;  %v291_v59 = vmul.f32 %v407_v62, %v662_v25 }
 0x151   :  { %v344_v56 = vadd.f32 %v705_v6, %v317_v54  ;;  %v292_v57 = vmul.f32 %v409_v21, %v671_v5 }
 0x152   :  { %363 = vst.msk [vmem:[%s849_s3 + $0x68] sm:$0xff] %vm34_vm0, %v343_v55  ;;  %v318_v58 = vmul.f32 %v699_v2, %v291_v59 }
 0x153   :  { %v411_v24 = vpop.eup %410  ;;  %364 = vst.msk [vmem:[%s849_s3 + $0x70] sm:$0xff] %vm34_vm0, %v344_v56  ;;  %v319_v60 = vmul.f32 %v699_v2, %v292_v57 }
 0x154   :  { %v413_v25 = vpop.eup %412  ;;  %v345_v61 = vadd.f32 %v705_v6, %v318_v58  ;;  %v293_v5 = vmul.f32 %v411_v24, %v674_v29 }
 0x155   :  { %v346_v0 = vadd.f32 %v705_v6, %v319_v60  ;;  %v294_v1 = vmul.f32 %v413_v25, %v683_v19 }
 0x156   :  { %365 = vst.msk [vmem:[%s849_s3 + $0x78] sm:$0xff] %vm34_vm0, %v345_v61  ;;  %v320_v3 = vmul.f32 %v699_v2, %v293_v5 }
 0x157   :  { %v415_v4 = vpop.eup %414  ;;  %366 = vst.msk [vmem:[%s849_s3 + $0x80] sm:$0xff] %vm34_vm0, %v346_v0  ;;  %v321_v63 = vmul.f32 %v699_v2, %v294_v1 }
 0x158   :  { %v347_v29 = vadd.f32 %v705_v6, %v320_v3  ;;  %v295_v8 = vmul.f32 %v415_v4, %v686_v33 }
 0x159   :  { %v348_v19 = vadd.f32 %v705_v6, %v321_v63 }
 0x15a   :  { %367 = vst.msk [vmem:[%s849_s3 + $0x88] sm:$0xff] %vm34_vm0, %v347_v29  ;;  %v322_v28 = vmul.f32 %v699_v2, %v295_v8 }
 0x15b   :  { %368 = vst.msk [vmem:[%s849_s3 + $0x90] sm:$0xff] %vm34_vm0, %v348_v19 }
 0x15c   :  { %v349_v7 = vadd.f32 %v705_v6, %v322_v28 }
 0x15e   :  { %369 = vst.msk [vmem:[%s849_s3 + $0x98] sm:$0xff] %vm34_vm0, %v349_v7 }

</bundles_post_ra>
